<compile_context>
chip_gen: v5e
topology: v5e:2x2
jax: 0.10.0
libtpu: 0.0.40
codegen_flags: <defaults>
</compile_context>

<pallas_src>
import functools

import jax
import jax.numpy as jnp
from jax.experimental import pallas as pl
from jax.experimental.pallas import tpu as pltpu

K_PAD = 896   # 784 padded to 7*128
H_PAD = 128   # 100 padded to 128
O_PAD = 128   # 10  padded to 128


def mlp_kernel(x_ref, w1_ref, b1_ref, w2_ref, b2_ref, out_ref):
    # fc1 on the MXU: (Bt, 896) bf16 @ (896, 128) bf16 -> f32 accumulator.
    h = jnp.dot(x_ref[...], w1_ref[...],
                preferred_element_type=jnp.float32)                 # (Bt, 128) f32
    # Bias + ReLU in f32 on the VPU (f32 path works on all generations).
    h = jnp.maximum(h + b1_ref[...], 0.0)
    # fc2 on the MXU: feed activations back down as bf16.
    o = jnp.dot(h.astype(jnp.bfloat16), w2_ref[...],
                preferred_element_type=jnp.float32)                 # (Bt, 128) f32
    out_ref[...] = o + b2_ref[...]


def _round_up(n, m):
    return -(-n // m) * m


@functools.partial(jax.jit, static_argnames=("block_b",))
def mlp_forward(x, w1_t, b1, w2_t, b2, *, block_b=512):
    """x: (B, 784) f32; w1_t: (784, 100); b1: (100,); w2_t: (100, 10); b2: (10,).

    Returns (B, 10) f32 logits, matching PyTorch fc2(relu(fc1(x))).
    """
    B, K = x.shape
    assert K == 28 * 28

    # Batch tile: multiple of 8 sublanes, capped at block_b.
    if B >= block_b:
        Bt = block_b
    else:
        Bt = max(8, _round_up(B, 8))
    B_pad = _round_up(B, Bt)

    # Zero-pad to lane-dense shapes; cast MXU operands to bf16 (halves DMA
    # bytes for x and the weights).  Biases stay f32.
    x_p = jnp.pad(x, ((0, B_pad - B), (0, K_PAD - K))).astype(jnp.bfloat16)
    w1_p = jnp.pad(w1_t, ((0, K_PAD - w1_t.shape[0]),
                          (0, H_PAD - w1_t.shape[1]))).astype(jnp.bfloat16)
    b1_p = jnp.pad(b1, (0, H_PAD - b1.shape[0])).reshape(1, H_PAD)
    w2_p = jnp.pad(w2_t, ((0, H_PAD - w2_t.shape[0]),
                          (0, O_PAD - w2_t.shape[1]))).astype(jnp.bfloat16)
    b2_p = jnp.pad(b2, (0, O_PAD - b2.shape[0])).reshape(1, O_PAD)

    grid = (B_pad // Bt,)

    flops = 2 * B_pad * (K_PAD * H_PAD + H_PAD * O_PAD)
    bytes_accessed = (x_p.size * 2 + w1_p.size * 2 + w2_p.size * 2
                      + b1_p.size * 4 + b2_p.size * 4 + B_pad * O_PAD * 4)

    out_padded = pl.pallas_call(
        mlp_kernel,
        out_shape=jax.ShapeDtypeStruct((B_pad, O_PAD), jnp.float32),
        grid=grid,
        in_specs=[
            pl.BlockSpec((Bt, K_PAD), lambda i: (i, 0)),      # x tile (pipelined)
            pl.BlockSpec((K_PAD, H_PAD), lambda i: (0, 0)),   # w1 resident
            pl.BlockSpec((1, H_PAD), lambda i: (0, 0)),       # b1 resident
            pl.BlockSpec((H_PAD, O_PAD), lambda i: (0, 0)),   # w2 resident
            pl.BlockSpec((1, O_PAD), lambda i: (0, 0)),       # b2 resident
        ],
        out_specs=pl.BlockSpec((Bt, O_PAD), lambda i: (i, 0)),
        compiler_params=pltpu.CompilerParams(
            dimension_semantics=("parallel",),
        ),
        cost_estimate=pl.CostEstimate(
            flops=flops,
            transcendentals=0,
            bytes_accessed=bytes_accessed,
        ),
    )(x_p, w1_p, b1_p, w2_p, b2_p)

    # Slice back to the logical (B, 10) shape.
    return out_padded[:B, :10]


def init_params(key):
    """PyTorch-style Linear init: U(-1/sqrt(fan_in), 1/sqrt(fan_in)).

    Weights stored pre-transposed as (in, out) so the kernel computes x @ W + b.
    """
    k1, k2, k3, k4 = jax.random.split(key, 4)
    in1, out1 = 28 * 28, 100
    in2, out2 = 100, 10
    bound1 = 1.0 / jnp.sqrt(in1)
    bound2 = 1.0 / jnp.sqrt(in2)
    w1_t = jax.random.uniform(k1, (in1, out1), jnp.float32, -bound1, bound1)
    b1 = jax.random.uniform(k2, (out1,), jnp.float32, -bound1, bound1)
    w2_t = jax.random.uniform(k3, (in2, out2), jnp.float32, -bound2, bound2)
    b2 = jax.random.uniform(k4, (out2,), jnp.float32, -bound2, bound2)
    return w1_t, b1, w2_t, b2


if __name__ == "__main__":
    key = jax.random.PRNGKey(0)
    kx, kp = jax.random.split(key)

    B = 8
    # Input shaped like MNIST NCHW images; forward flattens to (B, 784).
    x_img = jax.random.normal(kx, (B, 1, 28, 28), jnp.float32)
    x = x_img.reshape(B, -1)  # x.view(x.shape[0], -1)

    w1_t, b1, w2_t, b2 = init_params(kp)

    out = mlp_forward(x, w1_t, b1, w2_t, b2)
    out = jax.block_until_ready(out)

    # Reference check in plain JAX (f32). bf16 MXU inputs -> ~1e-2 tolerance.
    ref = jnp.maximum(x @ w1_t + b1, 0.0) @ w2_t + b2
    assert out.shape == (B, 10)
    assert jnp.allclose(out, ref, atol=2e-2, rtol=2e-2), (
        float(jnp.max(jnp.abs(out - ref))))

    print("KERNEL_OK")
</pallas_src>

<mosaic_0001>
module attributes {stable_mosaic.version = 11 : i64} {
  func.func @mlp_kernel(%arg0: i32, %arg1: memref<8x896xbf16, #tpu.memory_space<vmem>>, %arg2: memref<896x128xbf16, #tpu.memory_space<vmem>>, %arg3: memref<1x128xf32, #tpu.memory_space<vmem>>, %arg4: memref<128x128xbf16, #tpu.memory_space<vmem>>, %arg5: memref<1x128xf32, #tpu.memory_space<vmem>>, %arg6: memref<8x128xf32, #tpu.memory_space<vmem>>) attributes {dimension_semantics = [#tpu.dimension_semantics<parallel>], iteration_bounds = array<i64: 1>, scalar_prefetch = 0 : i64, scratch_operands = 0 : i64, tpu.core_type = #tpu.core_type<tc>, window_params = [{transform_indices = @transform_0, window_bounds = array<i64: 8, 896>}, {pipeline_mode = #tpu.pipeline_mode<synchronous>, transform_indices = @transform_1, window_bounds = array<i64: 896, 128>}, {pipeline_mode = #tpu.pipeline_mode<synchronous>, transform_indices = @transform_2, window_bounds = array<i64: 1, 128>}, {pipeline_mode = #tpu.pipeline_mode<synchronous>, transform_indices = @transform_3, window_bounds = array<i64: 128, 128>}, {pipeline_mode = #tpu.pipeline_mode<synchronous>, transform_indices = @transform_4, window_bounds = array<i64: 1, 128>}, {transform_indices = @transform_5, window_bounds = array<i64: 8, 128>}]} {
    %c0 = arith.constant 0 : index
    %c0_0 = arith.constant 0 : index
    %0 = vector.load %arg1[%c0, %c0_0] : memref<8x896xbf16, #tpu.memory_space<vmem>>, vector<8x896xbf16>
    %c0_1 = arith.constant 0 : index
    %c0_2 = arith.constant 0 : index
    %1 = vector.load %arg2[%c0_1, %c0_2] : memref<896x128xbf16, #tpu.memory_space<vmem>>, vector<896x128xbf16>
    %cst = arith.constant dense<0.000000e+00> : vector<8x128xf32>
    %2 = tpu.matmul %0, %1, %cst {dimension_numbers = #tpu.dot_dimension_numbers<[1], [0], [0], [1], [0, 0, 1, 1], [], []>} : vector<8x896xbf16>, vector<896x128xbf16>, vector<8x128xf32> -> vector<8x128xf32>
    %c0_3 = arith.constant 0 : index
    %c0_4 = arith.constant 0 : index
    %3 = vector.load %arg3[%c0_3, %c0_4] : memref<1x128xf32, #tpu.memory_space<vmem>>, vector<1x128xf32>
    %4 = vector.broadcast %3 : vector<1x128xf32> to vector<8x128xf32>
    %5 = arith.addf %2, %4 : vector<8x128xf32>
    %cst_5 = arith.constant 0.000000e+00 : f32
    %6 = vector.broadcast %cst_5 : f32 to vector<8x128xf32>
    %7 = arith.maximumf %5, %6 : vector<8x128xf32>
    %8 = arith.truncf %7 : vector<8x128xf32> to vector<8x128xbf16>
    %c0_6 = arith.constant 0 : index
    %c0_7 = arith.constant 0 : index
    %9 = vector.load %arg4[%c0_6, %c0_7] : memref<128x128xbf16, #tpu.memory_space<vmem>>, vector<128x128xbf16>
    %cst_8 = arith.constant dense<0.000000e+00> : vector<8x128xf32>
    %10 = tpu.matmul %8, %9, %cst_8 {dimension_numbers = #tpu.dot_dimension_numbers<[1], [0], [0], [1], [0, 0, 1, 1], [], []>} : vector<8x128xbf16>, vector<128x128xbf16>, vector<8x128xf32> -> vector<8x128xf32>
    %c0_9 = arith.constant 0 : index
    %c0_10 = arith.constant 0 : index
    %11 = vector.load %arg5[%c0_9, %c0_10] : memref<1x128xf32, #tpu.memory_space<vmem>>, vector<1x128xf32>
    %12 = vector.broadcast %11 : vector<1x128xf32> to vector<8x128xf32>
    %13 = arith.addf %10, %12 : vector<8x128xf32>
    %c0_11 = arith.constant 0 : index
    %c0_12 = arith.constant 0 : index
    %14 = vector.load %arg6[%c0_11, %c0_12] : memref<8x128xf32, #tpu.memory_space<vmem>>, vector<8x128xf32>
    tpu.vector_store %arg6[%c0_11, %c0_12], %13 {strides = array<i32>} : memref<8x128xf32, #tpu.memory_space<vmem>>, vector<8x128xf32>,
    return
  }
  func.func @transform_0(%arg0: i32) -> (i32, i32) {
    %c0_i32 = arith.constant 0 : i32
    %c0_i32_0 = arith.constant 0 : i32
    return %arg0, %c0_i32 : i32, i32
  }
  func.func @transform_1(%arg0: i32) -> (i32, i32) {
    %c0_i32 = arith.constant 0 : i32
    %c0_i32_0 = arith.constant 0 : i32
    %c0_i32_1 = arith.constant 0 : i32
    return %c0_i32, %c0_i32_0 : i32, i32
  }
  func.func @transform_2(%arg0: i32) -> (i32, i32) {
    %c0_i32 = arith.constant 0 : i32
    %c0_i32_0 = arith.constant 0 : i32
    %c0_i32_1 = arith.constant 0 : i32
    return %c0_i32, %c0_i32_0 : i32, i32
  }
  func.func @transform_3(%arg0: i32) -> (i32, i32) {
    %c0_i32 = arith.constant 0 : i32
    %c0_i32_0 = arith.constant 0 : i32
    %c0_i32_1 = arith.constant 0 : i32
    return %c0_i32, %c0_i32_0 : i32, i32
  }
  func.func @transform_4(%arg0: i32) -> (i32, i32) {
    %c0_i32 = arith.constant 0 : i32
    %c0_i32_0 = arith.constant 0 : i32
    %c0_i32_1 = arith.constant 0 : i32
    return %c0_i32, %c0_i32_0 : i32, i32
  }
  func.func @transform_5(%arg0: i32) -> (i32, i32) {
    %c0_i32 = arith.constant 0 : i32
    %c0_i32_0 = arith.constant 0 : i32
    return %arg0, %c0_i32 : i32, i32
  }
}

</mosaic_0001>

<bundles_post_ra>
// kernel: mlp_forward.1
= control target key start
LH: loop header
LB: loop body
LE: loop exit
PB: predicated region body
PF: predicated region fallthrough
CT: control target
= control target key end

     0   :  { %s1286_s0 = inlined_call_operand.vmem [shape: bf16[8,896], index: 0, kind: input, shape index: {}]   ;;  %s1287_s1 = inlined_call_operand.vmem [shape: bf16[896,128], index: 1, kind: input, shape index: {}]   ;;  %s1288_s2 = inlined_call_operand.vmem [shape: f32[1,128], index: 2, kind: input, shape index: {}]   ;;  %s1289_s3 = inlined_call_operand.vmem [shape: bf16[128,128], index: 3, kind: input, shape index: {}]   ;;  %s1290_s4 = inlined_call_operand.vmem [shape: f32[1,128], index: 4, kind: input, shape index: {}]   ;;  %s1291_s5 = inlined_call_operand.hbm [shape: f32[8,128], index: 5, kind: output, shape index: {}]  }
   0x1   :  { %v956_v0 = vld [vmem:[%s1287_s1 + $0x38] sm:$0xff]  ;;  %v955_v3 = vld [vmem:[%s1287_s1 + $0x30] sm:$0xff]  ;;  %v954_v7 = vld [vmem:[%s1287_s1 + $0x28] sm:$0xff] }
   0x2   :  { %v964_v1 = vld [vmem:[%s1287_s1 + $0x78] sm:$0xff]  ;;  %502 = vmatpush.bf16.msra.mxu0 %v956_v0  ;;  %v963_v4 = vld [vmem:[%s1287_s1 + $0x70] sm:$0xff]  ;;  %v962_v8 = vld [vmem:[%s1287_s1 + $0x68] sm:$0xff] }
   0x3   :  { %v972_v2 = vld [vmem:[%s1287_s1 + $0xb8] sm:$0xff]  ;;  %515 = vmatpush.bf16.msra.mxu1 %v964_v1  ;;  %v971_v5 = vld [vmem:[%s1287_s1 + $0xb0] sm:$0xff]  ;;  %v970_v9 = vld [vmem:[%s1287_s1 + $0xa8] sm:$0xff] }
   0x4   :  { %528 = vmatpush.bf16.msra.mxu2 %v972_v2  ;;  %v980_v6 = vld [vmem:[%s1287_s1 + $0xf8] sm:$0xff]  ;;  %v979_v10 = vld [vmem:[%s1287_s1 + $0xf0] sm:$0xff]  ;;  %v953_v11 = vld [vmem:[%s1287_s1 + $0x20] sm:$0xff] }
   0x5   :  { %541 = vmatpush.bf16.msra.mxu3 %v980_v6  ;;  %v961_v12 = vld [vmem:[%s1287_s1 + $0x60] sm:$0xff]  ;;  %v978_v14 = vld [vmem:[%s1287_s1 + $0xe8] sm:$0xff]  ;;  %v952_v15 = vld [vmem:[%s1287_s1 + $0x18] sm:$0xff] }
   0x6   :  { %503 = vmatpush.bf16.msra.mxu0 %v955_v3  ;;  %v969_v13 = vld [vmem:[%s1287_s1 + $0xa0] sm:$0xff]  ;;  %v960_v16 = vld [vmem:[%s1287_s1 + $0x58] sm:$0xff] }
   0x7   :  { %516 = vmatpush.bf16.msra.mxu1 %v963_v4  ;;  %v968_v17 = vld [vmem:[%s1287_s1 + $0x98] sm:$0xff]  ;;  %v977_v18 = vld [vmem:[%s1287_s1 + $0xe0] sm:$0xff] }
   0x8   :  { %529 = vmatpush.bf16.msra.mxu2 %v971_v5 }
   0x9   :  { %542 = vmatpush.bf16.msra.mxu3 %v979_v10 }
   0xa   :  { %504 = vmatpush.bf16.msra.mxu0 %v954_v7 }
   0xb   :  { %517 = vmatpush.bf16.msra.mxu1 %v962_v8 }
   0xc   :  { %530 = vmatpush.bf16.msra.mxu2 %v970_v9 }
   0xd   :  { %543 = vmatpush.bf16.msra.mxu3 %v978_v14 }
   0xe   :  { %505 = vmatpush.bf16.msra.mxu0 %v953_v11 }
   0xf   :  { %518 = vmatpush.bf16.msra.mxu1 %v961_v12 }
  0x10   :  { %531 = vmatpush.bf16.msra.mxu2 %v969_v13 }
  0x11   :  { %10 = vsyncpa [#allocation3], 0  ;;  %v951_v19 = vld [vmem:[%s1287_s1 + $0x10] sm:$0xff]  ;;  %544 = vmatpush.bf16.msra.mxu3 %v977_v18  ;;  %v976_v22 = vld [vmem:[%s1287_s1 + $0xd8] sm:$0xff]  ;;  %s1042_s29 = smov [#allocation2]   ;;  %s684_s8 = sshll.u32 %s1291_s5, 4  ;;  %s685_s8 = int_to_ptr.hbm [resolvable:$true] %s684_s8 }
  0x12   :  { %506 = vmatpush.bf16.msra.mxu0 %v952_v15  ;;  %v959_v20 = vld [vmem:[%s1287_s1 + $0x50] sm:$0xff]  ;;  %v950_v23 = vld [vmem:[%s1287_s1 + $0x8] sm:$0xff]  ;;  %v21_v25 = vld [vmem:[%s1286_s0] sm:$0xff]  ;;  %s682_s30 = sshll.u32 %s1042_s29, 4  ;;  %s683_s30 = int_to_ptr.vmem [resolvable:$true] %s682_s30 }
  0x13   :  { %519 = vmatpush.bf16.msra.mxu1 %v960_v16  ;;  %v967_v21 = vld [vmem:[%s1287_s1 + $0x90] sm:$0xff]  ;;  %v958_v24 = vld [vmem:[%s1287_s1 + $0x48] sm:$0xff]  ;;  %v145_v29 = vunpack.c.l.b16 %v21_v25  ;;  %v949_v30 = vld [vmem:[%s1287_s1] sm:$0xff]  ;;  %v146_v33 = vunpack.c.h.b16 %v21_v25 }
  0x14   :  { %532 = vmatpush.bf16.msra.mxu2 %v968_v17  ;;  %v966_v26 = vld [vmem:[%s1287_s1 + $0x88] sm:$0xff]  ;;  %v975_v27 = vld [vmem:[%s1287_s1 + $0xd0] sm:$0xff]  ;;  %v957_v31 = vld [vmem:[%s1287_s1 + $0x40] sm:$0xff] }
  0x15   :  { %545 = vmatpush.bf16.msra.mxu3 %v976_v22  ;;  %v22_v28 = vld [vmem:[%s1286_s0 + $0x8] sm:$0xff]  ;;  %v965_v34 = vld [vmem:[%s1287_s1 + $0x80] sm:$0xff]  ;;  %v988_v35 = vld [vmem:[%s1287_s1 + $0x138] sm:$0xff]  ;;  %v152_v38 = vpack.c.b16 %v145_v29, %v145_v29  ;;  %v153_v41 = vpack.c.b16 %v146_v33, %v146_v33 }
  0x16   :  { %507 = vmatpush.bf16.msra.mxu0 %v951_v19  ;;  %v147_v32 = vunpack.c.l.b16 %v22_v28  ;;  %v996_v36 = vld [vmem:[%s1287_s1 + $0x178] sm:$0xff]  ;;  %v974_v39 = vld [vmem:[%s1287_s1 + $0xc8] sm:$0xff]  ;;  %v987_v42 = vld [vmem:[%s1287_s1 + $0x130] sm:$0xff]  ;;  %v148_v46 = vunpack.c.h.b16 %v22_v28 }
  0x17   :  { %520 = vmatpush.bf16.msra.mxu1 %v959_v20  ;;  %v1004_v37 = vld [vmem:[%s1287_s1 + $0x1b8] sm:$0xff]  ;;  %v995_v43 = vld [vmem:[%s1287_s1 + $0x170] sm:$0xff]  ;;  %v973_v45 = vld [vmem:[%s1287_s1 + $0xc0] sm:$0xff] }
  0x18   :  { %533 = vmatpush.bf16.msra.mxu2 %v967_v21  ;;  %v154_v40 = vpack.c.b16 %v147_v32, %v147_v32  ;;  %v1003_v44 = vld [vmem:[%s1287_s1 + $0x1b0] sm:$0xff]  ;;  %v986_v47 = vld [vmem:[%s1287_s1 + $0x128] sm:$0xff]  ;;  %v155_v50 = vpack.c.b16 %v148_v46, %v148_v46  ;;  %v985_v51 = vld [vmem:[%s1287_s1 + $0x120] sm:$0xff] }
  0x19   :  { %546 = vmatpush.bf16.msra.mxu3 %v975_v27  ;;  %v994_v48 = vld [vmem:[%s1287_s1 + $0x168] sm:$0xff]  ;;  %v993_v52 = vld [vmem:[%s1287_s1 + $0x160] sm:$0xff]  ;;  %v984_v54 = vld [vmem:[%s1287_s1 + $0x118] sm:$0xff] }
  0x1a   :  { %508 = vmatpush.bf16.msra.mxu0 %v950_v23  ;;  %v1002_v49 = vld [vmem:[%s1287_s1 + $0x1a8] sm:$0xff]  ;;  %v1001_v53 = vld [vmem:[%s1287_s1 + $0x1a0] sm:$0xff]  ;;  %v992_v55 = vld [vmem:[%s1287_s1 + $0x158] sm:$0xff] }
  0x1b   :  { %521 = vmatpush.bf16.msra.mxu1 %v958_v24  ;;  %v1000_v56 = vld [vmem:[%s1287_s1 + $0x198] sm:$0xff]  ;;  %v983_v57 = vld [vmem:[%s1287_s1 + $0x110] sm:$0xff]  ;;  %v982_v60 = vld [vmem:[%s1287_s1 + $0x108] sm:$0xff] }
  0x1c   :  { %534 = vmatpush.bf16.msra.mxu2 %v966_v26  ;;  %v991_v58 = vld [vmem:[%s1287_s1 + $0x150] sm:$0xff]  ;;  %v990_v62 = vld [vmem:[%s1287_s1 + $0x148] sm:$0xff]  ;;  %v24_v0 = vld [vmem:[%s1286_s0 + $0x18] sm:$0xf] }
  0x1d   :  { %547 = vmatpush.bf16.msra.mxu3 %v974_v39  ;;  %v999_v59 = vld [vmem:[%s1287_s1 + $0x190] sm:$0xff]  ;;  %v998_v63 = vld [vmem:[%s1287_s1 + $0x188] sm:$0xff]  ;;  %v981_v2 = vld [vmem:[%s1287_s1 + $0x100] sm:$0xff]  ;;  %v151_v4 = vunpack.c.l.b16 %v24_v0 }
  0x1e   :  { %509 = vmatpush.bf16.msra.mxu0 %v949_v30  ;;  %v23_v61 = vld [vmem:[%s1286_s0 + $0x10] sm:$0xff]  ;;  %v989_v5 = vld [vmem:[%s1287_s1 + $0x140] sm:$0xff]  ;;  %v1012_v10 = vld [vmem:[%s1289_s3 + $0x38] sm:$0xff] }
  0x1f   :  { %522 = vmatpush.bf16.msra.mxu1 %v957_v31  ;;  %v149_v1 = vunpack.c.l.b16 %v23_v61  ;;  %v150_v3 = vunpack.c.h.b16 %v23_v61  ;;  %v997_v6 = vld [vmem:[%s1287_s1 + $0x180] sm:$0xff]  ;;  %v158_v9 = vpack.c.b16 %v151_v4, %v151_v4  ;;  %v1011_v11 = vld [vmem:[%s1289_s3 + $0x30] sm:$0xff]  ;;  %v1010_v12 = vld [vmem:[%s1289_s3 + $0x28] sm:$0xff] }
  0x20   :  { %535 = vmatpush.bf16.msra.mxu2 %v965_v34  ;;  %v1009_v13 = vld [vmem:[%s1289_s3 + $0x20] sm:$0xff]  ;;  %v1008_v14 = vld [vmem:[%s1289_s3 + $0x18] sm:$0xff]  ;;  %v1007_v15 = vld [vmem:[%s1289_s3 + $0x10] sm:$0xff] }
  0x21   :  { %510 = vmatmul.bf16.vlgmr.msra.gmra.mxu0 %v152_v38  ;;  %548 = vmatpush.bf16.msra.mxu3 %v973_v45  ;;  %v156_v7 = vpack.c.b16 %v149_v1, %v149_v1  ;;  %v157_v8 = vpack.c.b16 %v150_v3, %v150_v3  ;;  %v1006_v18 = vld [vmem:[%s1289_s3 + $0x8] sm:$0xff]  ;;  %v1005_v19 = vld [vmem:[%s1289_s3] sm:$0xff] }
  0x22   :  { %554 = vmatpush.bf16.msrb.mxu0 %v988_v35  ;;  %523 = vmatmul.bf16.vlgmr.msra.gmra.mxu1 %v153_v41  ;;  %v1014_v23 = vld [vmem:[%s1288_s2] ss:$0 sm:$0xff] }
  0x23   :  { %567 = vmatpush.bf16.msrb.mxu1 %v996_v36  ;;  %536 = vmatmul.bf16.vlgmr.msra.gmra.mxu2 %v154_v40 }
  0x24   :  { %580 = vmatpush.bf16.msrb.mxu2 %v1004_v37  ;;  %549 = vmatmul.bf16.vlgmr.msra.gmra.mxu3 %v155_v50 }
  0x25   :  { %663 = vmatpush.bf16.msrb.mxu3 %v1012_v10 }
  0x26   :  { %555 = vmatpush.bf16.msrb.mxu0 %v987_v42  ;;  %v1015_v42 = vld [vmem:[%s1290_s4] ss:$0 sm:$0xff] }
  0x27   :  { %568 = vmatpush.bf16.msrb.mxu1 %v995_v43 }
  0x28   :  { %581 = vmatpush.bf16.msrb.mxu2 %v1003_v44 }
  0x29   :  { %664 = vmatpush.bf16.msrb.mxu3 %v1011_v11 }
  0x2a   :  { %556 = vmatpush.bf16.msrb.mxu0 %v986_v47 }
  0x2b   :  { %569 = vmatpush.bf16.msrb.mxu1 %v994_v48 }
  0x2c   :  { %582 = vmatpush.bf16.msrb.mxu2 %v1002_v49 }
  0x2d   :  { %665 = vmatpush.bf16.msrb.mxu3 %v1010_v12 }
  0x2e   :  { %557 = vmatpush.bf16.msrb.mxu0 %v985_v51 }
  0x2f   :  { %570 = vmatpush.bf16.msrb.mxu1 %v993_v52 }
  0x30   :  { %583 = vmatpush.bf16.msrb.mxu2 %v1001_v53 }
  0x31   :  { %666 = vmatpush.bf16.msrb.mxu3 %v1009_v13 }
  0x32   :  { %558 = vmatpush.bf16.msrb.mxu0 %v984_v54 }
  0x33   :  { %571 = vmatpush.bf16.msrb.mxu1 %v992_v55 }
  0x34   :  { %584 = vmatpush.bf16.msrb.mxu2 %v1000_v56 }
  0x35   :  { %667 = vmatpush.bf16.msrb.mxu3 %v1008_v14 }
  0x36   :  { %559 = vmatpush.bf16.msrb.mxu0 %v983_v57 }
  0x37   :  { %572 = vmatpush.bf16.msrb.mxu1 %v991_v58 }
  0x38   :  { %585 = vmatpush.bf16.msrb.mxu2 %v999_v59 }
  0x39   :  { %668 = vmatpush.bf16.msrb.mxu3 %v1007_v15 }
  0x3a   :  { %560 = vmatpush.bf16.msrb.mxu0 %v982_v60 }
  0x3b   :  { %573 = vmatpush.bf16.msrb.mxu1 %v990_v62 }
  0x3c   :  { %586 = vmatpush.bf16.msrb.mxu2 %v998_v63 }
  0x3d   :  { %669 = vmatpush.bf16.msrb.mxu3 %v1006_v18 }
  0x3e   :  { %561 = vmatpush.bf16.msrb.mxu0 %v981_v2 }
  0x3f   :  { %574 = vmatpush.bf16.msrb.mxu1 %v989_v5 }
  0x40   :  { %587 = vmatpush.bf16.msrb.mxu2 %v997_v6 }
  0x41   :  { %562 = vmatmul.bf16.vlgmr.msrb.gmra.mxu0 %v156_v7  ;;  %670 = vmatpush.bf16.msrb.mxu3 %v1005_v19 }
  0x42   :  { %575 = vmatmul.bf16.vlgmr.msrb.gmra.mxu1 %v157_v8 }
  0x43   :  { %588 = vmatmul.bf16.vlgmr.msrb.gmra.mxu2 %v158_v9 }
  0x9e   :  { %v511_v16 = vpop.f32.mrf.mxu0 }
  0x9f   :  { %v524_v17 = vpop.f32.mrf.mxu1  ;;  %v512_v26 = vadd.f32 %v1014_v23, %v511_v16 }
  0xa1   :  { %v525_v27 = vadd.f32 %v524_v17, %v512_v26 }
  0xa6   :  { %v537_v20 = vpop.f32.mrf.mxu2  ;;  %v513_v21 = vpop.f32.mrf.mxu0 }
  0xa7   :  { %v526_v22 = vpop.f32.mrf.mxu1  ;;  %v550_v24 = vpop.f32.mrf.mxu3  ;;  %v538_v29 = vadd.f32 %v537_v20, %v525_v27 }
  0xa9   :  { %v551_v30 = vadd.f32 %v550_v24, %v538_v29 }
  0xae   :  { %v539_v25 = vpop.f32.mrf.mxu2 }
  0xaf   :  { %v552_v28 = vpop.f32.mrf.mxu3 }
  0xbe   :  { %v563_v31 = vpop.f32.mrf.mxu0 }
  0xbf   :  { %v576_v32 = vpop.f32.mrf.mxu1  ;;  %v564_v33 = vadd.f32 %v563_v31, %v551_v30 }
  0xc1   :  { %v577_v34 = vadd.f32 %v576_v32, %v564_v33 }
  0xc6   :  { %v589_v35 = vpop.f32.mrf.mxu2  ;;  %v565_v37 = vpop.f32.mrf.mxu0 }
  0xc7   :  { %v590_v36 = vadd.f32 %v589_v35, %v577_v34  ;;  %v578_v38 = vpop.f32.mrf.mxu1 }
  0xc9   :  { %v593_v39 = vmax.f32 %v590_v36, 0.0 }
  0xcb   :  { %v594_v40 = vpack.c.bf16 %v593_v39, %v593_v39 }
  0xcd   :  { %671 = vmatmul.bf16.vlgmr.msrb.gmra.mxu3 %v594_v40 }
  0xce   :  { %v591_v41 = vpop.f32.mrf.mxu2 }
 0x150   :  { %v672_v43 = vpop.f32.mrf.mxu3 }
 0x151   :  { %v673_v44 = vadd.f32 %v1015_v42, %v672_v43 }
 0x153   :  { %676 = vst [vmem:[#allocation2] sm:$0xff] %v673_v44 }
 0x154   :  { %687 = dma.vmem_to_hbm [thread:$0]  %s683_s30, 128, %s685_s8, [#allocation3]  }
 0x158   :  { %v674_v45 = vpop.f32.mrf.mxu3 }
 0x159   :  { %1040 = dma.done.wait [#allocation3], 128  }
 0x15a   :  { %1041 = vsyncadd [#allocation3], 4294967168 }
 0x15b   :  { %692 = vsyncpa [#allocation3], 1 }

</bundles_post_ra>
